<compile_context>
chip_gen: v6e
topology: v6e:2x2x1
jax: 0.10.0
libtpu: 0.0.40
codegen_flags: <defaults>
</compile_context>

<pallas_src>
import functools

import jax
import jax.numpy as jnp
from jax.experimental import pallas as pl
from jax.experimental.pallas import tpu as pltpu


# ---------------------------------------------------------------------------
# Kernel
# ---------------------------------------------------------------------------
def _dueling_kernel(x_ref, wf_ref, w1_ref, w2_ref, b_ref, out_ref, *, n_act):
    """One batch tile: x (TB, I) -> [adv | val] (TB, A+1).

    b_ref is a packed (5, H) f32 slab:
      row 0: feature bias            row 1: LayerNorm gamma
      row 2: LayerNorm beta          row 3: fused hidden bias [ba1 | bv1]
      row 4: fused output bias [ba2 | bv2] zero-padded to H lanes
    """
    bf = b_ref[0:1, :]
    gamma = b_ref[1:2, :]
    beta = b_ref[2:3, :]
    b1 = b_ref[3:4, :]
    b2 = b_ref[4:5, :][:, : n_act + 1]

    # Feature Linear (bf16 operands, f32 accumulate) + LayerNorm + ReLU.
    x = x_ref[...].astype(jnp.bfloat16)
    h = jnp.dot(x, wf_ref[...], preferred_element_type=jnp.float32) + bf
    mu = jnp.mean(h, axis=-1, keepdims=True)
    var = jnp.mean(h * h, axis=-1, keepdims=True) - mu * mu   # single-pass stats
    h = (h - mu) * jax.lax.rsqrt(var + 1e-5) * gamma + beta
    h = jnp.maximum(h, 0.0)                                   # (TB, H) f32

    # Fused hidden layers of both heads: [a1 | v1] in one matmul.
    hv = jnp.dot(h.astype(jnp.bfloat16), w1_ref[...],
                 preferred_element_type=jnp.float32) + b1
    hv = jnp.maximum(hv, 0.0)                                 # (TB, H) = [a1 | v1]

    # Fused output layers via block-diagonal weight: [adv | val] in one matmul.
    y = jnp.dot(hv.astype(jnp.bfloat16), w2_ref[...],
                preferred_element_type=jnp.float32) + b2      # (TB, A+1)

    out_ref[...] = y.astype(out_ref.dtype)                    # single lane-contiguous store


# ---------------------------------------------------------------------------
# Wrapper
# ---------------------------------------------------------------------------
def dueling_dqn_forward(x, packed, *, max_block_rows=512):
    """x: (B, input_size) f32. packed: output of pack_params(). Returns (B, A)."""
    B, I = x.shape
    H = packed["wf"].shape[1]
    Ap1 = packed["w2"].shape[1]
    A = Ap1 - 1

    # Pad batch to a sublane multiple (8) and to a multiple of the tile size.
    b_pad = ((B + 7) // 8) * 8
    tb = min(b_pad, max_block_rows)
    b_pad = ((b_pad + tb - 1) // tb) * tb
    if b_pad != B:
        x = jnp.pad(x, ((0, b_pad - B), (0, 0)))

    grid = (b_pad // tb,)

    flops = 2 * b_pad * (I * H + H * H + H * Ap1) + 12 * b_pad * H
    bytes_accessed = (
        x.size * x.dtype.itemsize
        + 2 * (packed["wf"].size + packed["w1"].size + packed["w2"].size)  # bf16
        + 4 * packed["biases"].size
        + 4 * b_pad * Ap1
    )

    y = pl.pallas_call(
        functools.partial(_dueling_kernel, n_act=A),
        out_shape=jax.ShapeDtypeStruct((b_pad, Ap1), jnp.float32),
        grid=grid,
        in_specs=[
            pl.BlockSpec((tb, I), lambda i: (i, 0)),     # x: streamed over batch
            pl.BlockSpec((I, H), lambda i: (0, 0)),      # wf: resident
            pl.BlockSpec((H, H), lambda i: (0, 0)),      # fused hidden weight
            pl.BlockSpec((H, Ap1), lambda i: (0, 0)),    # fused (block-diag) output weight
            pl.BlockSpec((5, H), lambda i: (0, 0)),      # packed bias/LN slab
        ],
        out_specs=pl.BlockSpec((tb, Ap1), lambda i: (i, 0)),
        compiler_params=pltpu.CompilerParams(dimension_semantics=("parallel",)),
        cost_estimate=pl.CostEstimate(
            flops=flops, transcendentals=b_pad, bytes_accessed=bytes_accessed
        ),
    )(x, packed["wf"], packed["w1"], packed["w2"], packed["biases"])

    y = y[:B]
    adv = y[:, :A]
    val = y[:, A:]
    # Global scalar mean over the whole (B, A) advantage tensor, exactly like the
    # module's adv.mean(); done in XLA so the batch grid axis can stay "parallel".
    return val + adv - jnp.mean(adv)


# ---------------------------------------------------------------------------
# Parameters
# ---------------------------------------------------------------------------
def init_params(key, input_size, hidden_size, output_size):
    """Deterministic synthetic parameters (not a checkpoint load).

    Linear weights are stored as (in, out) (transpose of PyTorch's (out, in));
    biases are (1, out).
    """
    assert hidden_size % 2 == 0
    h2 = hidden_size // 2
    ks = jax.random.split(key, 10)

    def lin(kw, kb, fan_in, fan_out):
        bound = 1.0 / jnp.sqrt(fan_in)
        w = jax.random.uniform(kw, (fan_in, fan_out), jnp.float32, -bound, bound)
        b = jax.random.uniform(kb, (1, fan_out), jnp.float32, -bound, bound)
        return w, b

    wf, bf = lin(ks[0], ks[1], input_size, hidden_size)
    wa1, ba1 = lin(ks[2], ks[3], hidden_size, h2)
    wa2, ba2 = lin(ks[4], ks[5], h2, output_size)
    wv1, bv1 = lin(ks[6], ks[7], hidden_size, h2)
    wv2, bv2 = lin(ks[8], ks[9], h2, 1)

    return {
        "wf": wf, "bf": bf,
        "ln_g": jnp.ones((1, hidden_size), jnp.float32),
        "ln_b": jnp.zeros((1, hidden_size), jnp.float32),
        "wa1": wa1, "ba1": ba1,
        "wa2": wa2, "ba2": ba2,
        "wv1": wv1, "bv1": bv1,
        "wv2": wv2, "bv2": bv2,
    }


def pack_params(p):
    """Fuse head weights, pack biases, cast matmul weights to bf16."""
    H = p["wf"].shape[1]
    h2 = H // 2
    A = p["wa2"].shape[1]
    assert A + 1 <= H, "bias slab assumes output_size + 1 <= hidden_size"

    # Fused hidden weight: [wa1 | wv1]  -> (H, H)
    w1 = jnp.concatenate([p["wa1"], p["wv1"]], axis=1)

    # Fused output weight: block-diag([[wa2, 0], [0, wv2]]) -> (H, A+1)
    w2 = jnp.zeros((H, A + 1), jnp.float32)
    w2 = w2.at[:h2, :A].set(p["wa2"])
    w2 = w2.at[h2:, A:].set(p["wv2"])

    # Packed bias / LayerNorm slab (5, H), f32.
    b2_row = jnp.zeros((H,), jnp.float32).at[: A + 1].set(
        jnp.concatenate([p["ba2"][0], p["bv2"][0]])
    )
    biases = jnp.stack(
        [
            p["bf"][0],
            p["ln_g"][0],
            p["ln_b"][0],
            jnp.concatenate([p["ba1"][0], p["bv1"][0]]),
            b2_row,
        ],
        axis=0,
    )

    return {
        "wf": p["wf"].astype(jnp.bfloat16),
        "w1": w1.astype(jnp.bfloat16),
        "w2": w2.astype(jnp.bfloat16),
        "biases": biases,
    }


# ---------------------------------------------------------------------------
# References
# ---------------------------------------------------------------------------
def reference_forward_f32(x, p):
    """Pure-JAX f32 reference mirroring the PyTorch module exactly."""
    h = x @ p["wf"] + p["bf"]
    mu = jnp.mean(h, axis=-1, keepdims=True)
    var = jnp.mean((h - mu) ** 2, axis=-1, keepdims=True)
    h = (h - mu) / jnp.sqrt(var + 1e-5) * p["ln_g"] + p["ln_b"]
    h = jax.nn.relu(h)
    adv = jax.nn.relu(h @ p["wa1"] + p["ba1"]) @ p["wa2"] + p["ba2"]
    val = jax.nn.relu(h @ p["wv1"] + p["bv1"]) @ p["wv2"] + p["bv2"]
    return val + adv - jnp.mean(adv)


def reference_forward_matched(x, p):
    """Same module math but with bf16 matmul operands (matches kernel numerics)."""
    def mm(a, w):
        return jnp.dot(a.astype(jnp.bfloat16), w.astype(jnp.bfloat16),
                       preferred_element_type=jnp.float32)

    h = mm(x, p["wf"]) + p["bf"]
    mu = jnp.mean(h, axis=-1, keepdims=True)
    var = jnp.mean(h * h, axis=-1, keepdims=True) - mu * mu
    h = (h - mu) * jax.lax.rsqrt(var + 1e-5) * p["ln_g"] + p["ln_b"]
    h = jnp.maximum(h, 0.0)
    adv = jnp.maximum(mm(h, p["wa1"]) + p["ba1"], 0.0)
    adv = mm(adv, p["wa2"]) + p["ba2"]
    val = jnp.maximum(mm(h, p["wv1"]) + p["bv1"], 0.0)
    val = mm(val, p["wv2"]) + p["bv2"]
    return val + adv - jnp.mean(adv)


# ---------------------------------------------------------------------------
if __name__ == "__main__":
    B, INPUT, HIDDEN, OUTPUT = 2, 16, 32, 4

    key = jax.random.PRNGKey(0)
    kx, kp = jax.random.split(key)
    x = jax.random.normal(kx, (B, INPUT), jnp.float32)
    raw = init_params(kp, INPUT, HIDDEN, OUTPUT)
    packed = pack_params(raw)

    out = dueling_dqn_forward(x, packed)
    out = jax.block_until_ready(out)
    assert out.shape == (B, OUTPUT)

    # Exact-math check against a reference using the same bf16 matmul operands.
    ref_matched = reference_forward_matched(x, raw)
    assert jnp.allclose(out, ref_matched, atol=2e-3, rtol=2e-3), (out, ref_matched)

    # Faithfulness check against the full-f32 module semantics (bf16 operand
    # rounding is the only difference; tolerance sized for that).
    ref_f32 = reference_forward_f32(x, raw)
    assert jnp.allclose(out, ref_f32, atol=1e-1, rtol=1e-1), (out, ref_f32)

    print("KERNEL_OK")
</pallas_src>

<mosaic_0001>
module attributes {stable_mosaic.version = 11 : i64} {
  func.func @_dueling_kernel(%arg0: i32, %arg1: memref<8x16xf32, #tpu.memory_space<vmem>>, %arg2: memref<16x32xbf16, #tpu.memory_space<vmem>>, %arg3: memref<32x32xbf16, #tpu.memory_space<vmem>>, %arg4: memref<32x5xbf16, #tpu.memory_space<vmem>>, %arg5: memref<5x32xf32, #tpu.memory_space<vmem>>, %arg6: memref<8x5xf32, #tpu.memory_space<vmem>>) attributes {dimension_semantics = [#tpu.dimension_semantics<parallel>], iteration_bounds = array<i64: 1>, scalar_prefetch = 0 : i64, scratch_operands = 0 : i64, tpu.core_type = #tpu.core_type<tc>, window_params = [{transform_indices = @transform_0, window_bounds = array<i64: 8, 16>}, {pipeline_mode = #tpu.pipeline_mode<synchronous>, transform_indices = @transform_1, window_bounds = array<i64: 16, 32>}, {pipeline_mode = #tpu.pipeline_mode<synchronous>, transform_indices = @transform_2, window_bounds = array<i64: 32, 32>}, {pipeline_mode = #tpu.pipeline_mode<synchronous>, transform_indices = @transform_3, window_bounds = array<i64: 32, 5>}, {pipeline_mode = #tpu.pipeline_mode<synchronous>, transform_indices = @transform_4, window_bounds = array<i64: 5, 32>}, {transform_indices = @transform_5, window_bounds = array<i64: 8, 5>}]} {
    %c0 = arith.constant 0 : index
    %c0_0 = arith.constant 0 : index
    %0 = vector.load %arg5[%c0, %c0_0] : memref<5x32xf32, #tpu.memory_space<vmem>>, vector<1x32xf32>
    %c1 = arith.constant 1 : index
    %c0_1 = arith.constant 0 : index
    %1 = vector.load %arg5[%c1, %c0_1] : memref<5x32xf32, #tpu.memory_space<vmem>>, vector<1x32xf32>
    %c2 = arith.constant 2 : index
    %c0_2 = arith.constant 0 : index
    %2 = vector.load %arg5[%c2, %c0_2] : memref<5x32xf32, #tpu.memory_space<vmem>>, vector<1x32xf32>
    %c3 = arith.constant 3 : index
    %c0_3 = arith.constant 0 : index
    %3 = vector.load %arg5[%c3, %c0_3] : memref<5x32xf32, #tpu.memory_space<vmem>>, vector<1x32xf32>
    %c4 = arith.constant 4 : index
    %c0_4 = arith.constant 0 : index
    %4 = vector.load %arg5[%c4, %c0_4] : memref<5x32xf32, #tpu.memory_space<vmem>>, vector<1x32xf32>
    %5 = vector.extract_strided_slice %4 {offsets = [0, 0], sizes = [1, 5], strides = [1, 1]} : vector<1x32xf32> to vector<1x5xf32>
    %c0_5 = arith.constant 0 : index
    %c0_6 = arith.constant 0 : index
    %6 = vector.load %arg1[%c0_5, %c0_6] : memref<8x16xf32, #tpu.memory_space<vmem>>, vector<8x16xf32>
    %7 = arith.truncf %6 : vector<8x16xf32> to vector<8x16xbf16>
    %c0_7 = arith.constant 0 : index
    %c0_8 = arith.constant 0 : index
    %8 = vector.load %arg2[%c0_7, %c0_8] : memref<16x32xbf16, #tpu.memory_space<vmem>>, vector<16x32xbf16>
    %cst = arith.constant dense<0.000000e+00> : vector<8x32xf32>
    %9 = tpu.matmul %7, %8, %cst {dimension_numbers = #tpu.dot_dimension_numbers<[1], [0], [0], [1], [0, 0, 1, 1], [], []>} : vector<8x16xbf16>, vector<16x32xbf16>, vector<8x32xf32> -> vector<8x32xf32>
    %10 = vector.broadcast %0 : vector<1x32xf32> to vector<8x32xf32>
    %11 = arith.addf %9, %10 : vector<8x32xf32>
    %cst_9 = arith.constant dense<0.000000e+00> : vector<8xf32>
    %12 = vector.multi_reduction <add>, %11, %cst_9 [1] : vector<8x32xf32> to vector<8xf32>
    %13 = vector.shape_cast %12 : vector<8xf32> to vector<8x1xf32>
    %cst_10 = arith.constant 3.200000e+01 : f32
    %14 = vector.broadcast %cst_10 : f32 to vector<8x1xf32>
    %15 = arith.divf %13, %14 : vector<8x1xf32>
    %16 = arith.mulf %11, %11 : vector<8x32xf32>
    %cst_11 = arith.constant dense<0.000000e+00> : vector<8xf32>
    %17 = vector.multi_reduction <add>, %16, %cst_11 [1] : vector<8x32xf32> to vector<8xf32>
    %18 = vector.shape_cast %17 : vector<8xf32> to vector<8x1xf32>
    %cst_12 = arith.constant 3.200000e+01 : f32
    %19 = vector.broadcast %cst_12 : f32 to vector<8x1xf32>
    %20 = arith.divf %18, %19 : vector<8x1xf32>
    %21 = arith.mulf %15, %15 : vector<8x1xf32>
    %22 = arith.subf %20, %21 : vector<8x1xf32>
    %23 = vector.broadcast %15 : vector<8x1xf32> to vector<8x32xf32>
    %24 = arith.subf %11, %23 : vector<8x32xf32>
    %cst_13 = arith.constant 9.99999974E-6 : f32
    %25 = vector.broadcast %cst_13 : f32 to vector<8x1xf32>
    %26 = arith.addf %22, %25 : vector<8x1xf32>
    %27 = math.rsqrt %26 : vector<8x1xf32>
    %28 = vector.broadcast %27 : vector<8x1xf32> to vector<8x32xf32>
    %29 = arith.mulf %24, %28 : vector<8x32xf32>
    %30 = vector.broadcast %1 : vector<1x32xf32> to vector<8x32xf32>
    %31 = arith.mulf %29, %30 : vector<8x32xf32>
    %32 = vector.broadcast %2 : vector<1x32xf32> to vector<8x32xf32>
    %33 = arith.addf %31, %32 : vector<8x32xf32>
    %cst_14 = arith.constant 0.000000e+00 : f32
    %34 = vector.broadcast %cst_14 : f32 to vector<8x32xf32>
    %35 = arith.maximumf %33, %34 : vector<8x32xf32>
    %36 = arith.truncf %35 : vector<8x32xf32> to vector<8x32xbf16>
    %c0_15 = arith.constant 0 : index
    %c0_16 = arith.constant 0 : index
    %37 = vector.load %arg3[%c0_15, %c0_16] : memref<32x32xbf16, #tpu.memory_space<vmem>>, vector<32x32xbf16>
    %cst_17 = arith.constant dense<0.000000e+00> : vector<8x32xf32>
    %38 = tpu.matmul %36, %37, %cst_17 {dimension_numbers = #tpu.dot_dimension_numbers<[1], [0], [0], [1], [0, 0, 1, 1], [], []>} : vector<8x32xbf16>, vector<32x32xbf16>, vector<8x32xf32> -> vector<8x32xf32>
    %39 = vector.broadcast %3 : vector<1x32xf32> to vector<8x32xf32>
    %40 = arith.addf %38, %39 : vector<8x32xf32>
    %cst_18 = arith.constant 0.000000e+00 : f32
    %41 = vector.broadcast %cst_18 : f32 to vector<8x32xf32>
    %42 = arith.maximumf %40, %41 : vector<8x32xf32>
    %43 = arith.truncf %42 : vector<8x32xf32> to vector<8x32xbf16>
    %c0_19 = arith.constant 0 : index
    %c0_20 = arith.constant 0 : index
    %44 = vector.load %arg4[%c0_19, %c0_20] : memref<32x5xbf16, #tpu.memory_space<vmem>>, vector<32x5xbf16>
    %cst_21 = arith.constant dense<0.000000e+00> : vector<8x5xf32>
    %45 = tpu.matmul %43, %44, %cst_21 {dimension_numbers = #tpu.dot_dimension_numbers<[1], [0], [0], [1], [0, 0, 1, 1], [], []>} : vector<8x32xbf16>, vector<32x5xbf16>, vector<8x5xf32> -> vector<8x5xf32>
    %46 = vector.broadcast %5 : vector<1x5xf32> to vector<8x5xf32>
    %47 = arith.addf %45, %46 : vector<8x5xf32>
    %c0_22 = arith.constant 0 : index
    %c0_23 = arith.constant 0 : index
    %48 = vector.load %arg6[%c0_22, %c0_23] : memref<8x5xf32, #tpu.memory_space<vmem>>, vector<8x5xf32>
    tpu.vector_store %arg6[%c0_22, %c0_23], %47 {strides = array<i32>} : memref<8x5xf32, #tpu.memory_space<vmem>>, vector<8x5xf32>,
    return
  }
  func.func @transform_0(%arg0: i32) -> (i32, i32) {
    %c0_i32 = arith.constant 0 : i32
    %c0_i32_0 = arith.constant 0 : i32
    return %arg0, %c0_i32 : i32, i32
  }
  func.func @transform_1(%arg0: i32) -> (i32, i32) {
    %c0_i32 = arith.constant 0 : i32
    %c0_i32_0 = arith.constant 0 : i32
    %c0_i32_1 = arith.constant 0 : i32
    return %c0_i32, %c0_i32_0 : i32, i32
  }
  func.func @transform_2(%arg0: i32) -> (i32, i32) {
    %c0_i32 = arith.constant 0 : i32
    %c0_i32_0 = arith.constant 0 : i32
    %c0_i32_1 = arith.constant 0 : i32
    return %c0_i32, %c0_i32_0 : i32, i32
  }
  func.func @transform_3(%arg0: i32) -> (i32, i32) {
    %c0_i32 = arith.constant 0 : i32
    %c0_i32_0 = arith.constant 0 : i32
    %c0_i32_1 = arith.constant 0 : i32
    return %c0_i32, %c0_i32_0 : i32, i32
  }
  func.func @transform_4(%arg0: i32) -> (i32, i32) {
    %c0_i32 = arith.constant 0 : i32
    %c0_i32_0 = arith.constant 0 : i32
    %c0_i32_1 = arith.constant 0 : i32
    return %c0_i32, %c0_i32_0 : i32, i32
  }
  func.func @transform_5(%arg0: i32) -> (i32, i32) {
    %c0_i32 = arith.constant 0 : i32
    %c0_i32_0 = arith.constant 0 : i32
    return %arg0, %c0_i32 : i32, i32
  }
}

</mosaic_0001>

<bundles_post_ra>
// kernel: tpu_custom_call.1
= control target key start
LH: loop header
LB: loop body
LE: loop exit
PB: predicated region body
PF: predicated region fallthrough
CT: control target
= control target key end

     0   :  { %10 = vsyncpa [#allocation3], 0  ;;  %s486_s0 = inlined_call_operand.hbm [shape: f32[8,16], index: 0, kind: input, shape index: {}]   ;;  %s487_s1 = inlined_call_operand.hbm [shape: bf16[16,32], index: 1, kind: input, shape index: {}]   ;;  %s488_s2 = inlined_call_operand.vmem [shape: bf16[32,32], index: 2, kind: input, shape index: {}]   ;;  %s489_s3 = inlined_call_operand.vmem [shape: bf16[32,5], index: 3, kind: input, shape index: {}]   ;;  %s490_s4 = inlined_call_operand.vmem [shape: f32[5,32], index: 4, kind: input, shape index: {}]   ;;  %s491_s5 = inlined_call_operand.hbm [shape: f32[8,5], index: 5, kind: output, shape index: {}]  }
   0x1   :  { %11 = vsyncpa [#allocation6], 0 }
   0x2   :  { %12 = vsyncpa [#allocation4], 0  ;;  %s409_s18 = smov [#allocation2]   ;;  %s410_s20 = smov [#allocation5]  }
   0x3   :  { %s19_s19 = sshll.u32 %s409_s18, 4  ;;  %s28_s21 = sshll.u32 %s410_s20, 4  ;;  %s20_s19 = int_to_ptr.vmem [resolvable:$true] %s19_s19  ;;  %s29_s21 = int_to_ptr.vmem [resolvable:$true] %s28_s21 }
   0x4   :  { %s351_s22 = scalar_lea.vmem %s20_s19, 128  ;;  %p356_p1 = scmp.lt.s32.totalorder %s20_s19, %s20_s19 }
   0x5   :  { %p352_p0 = scmp.ne.s32.totalorder %s20_s19, %s351_s22  ;;  %p357_p2 = scmp.lt.s32.totalorder %s351_s22, %s351_s22 }
   0x7   :  { %p358_p3 = por %p357_p2, %p356_p1 }
   0x9   :  { %p359_p4 = pnand %p358_p3, %p352_p0 }
   0xb   :  { %362 = shalt.err (!%p359_p4)
}
   0xc   :  { %22 = dma.hbm_to_vmem [thread:$0]  %s486_s0, 128, %s20_s19, [#allocation3]  }
   0xd   :  { %s371_s25 = scalar_lea.vmem %s29_s21, 128  ;;  %p376_p6 = scmp.lt.s32.totalorder %s29_s21, %s29_s21 }
   0xe   :  { %p372_p5 = scmp.ne.s32.totalorder %s29_s21, %s371_s25  ;;  %p377_p7 = scmp.lt.s32.totalorder %s371_s25, %s371_s25 }
  0x10   :  { %p378_p8 = por %p377_p7, %p376_p6 }
  0x12   :  { %p379_p9 = pnand %p378_p8, %p372_p5 }
  0x14   :  { %382 = shalt.err (!%p379_p9)
}
  0x15   :  { %s411_s26 = smov 64   ;;  %s412_s27 = smov 4  }
  0x16   :  { %34 = dma.hbm_to_vmem [thread:$0]  %s487_s1, 128, %s29_s21, [#allocation6], %s411_s26, %s411_s26, %s412_s27  }
  0x17   :  { %403 = dma.done.wait [#allocation3], 128  }
  0x18   :  { %404 = vsyncadd [#allocation3], 4294967168 }
  0x19   :  { %405 = dma.done.wait [#allocation6], 128  }
  0x1a   :  { %406 = vsyncadd [#allocation6], 4294967168  ;;  %v413_v0 = vmov 0.0   ;;  %vm414_vm0 = vmmov 0   ;;  %v336_v1 = vld [vmem:[#allocation5] sm:$0xff]   ;;  %v53_v2 = vld [vmem:[#allocation2] sm:$0xff] }
  0x1b   :  { %307 = vmatprep.subr.bf16.mxu0 %v413_v0  ;;  %309 = vmatprep.mubr.msk.bf16.mxu0 %vm414_vm0, %v413_v0  ;;  %vm67_vm1 = vcmask 130048   ;;  %v54_v3 = vpack.c.bf16 %v53_v2, %v53_v2  ;;  %v286_v4 = vld [vmem:[%s490_s4] ss:$0 sm:$0xff]  ;;  %vm111_vm2 = vcmask 261120   ;;  %v337_v13 = vld [vmem:[%s488_s2 + $0x8] sm:$0xff]   ;;  %s415_s20 = smov [#allocation7]  }
  0x1c   :  { %313 = vmatprep.subr.bf16.mxu1 %v413_v0  ;;  %317 = vmatprep.mubr.msk.bf16.mxu1 %vm414_vm0, %v413_v0  ;;  %v338_v14 = vld [vmem:[%s488_s2] sm:$0xff]   ;;  %v339_v15 = vld [vmem:[%s489_s3 + $0x8] sm:$0xff]   ;;  %vm268_vm3 = vcmask 39936  }
  0x1d   :  { %308 = vmatpush3.bf16.msra.mxu0 %v336_v1  ;;  %314 = vmatpush3.bf16.msra.mxu1 %v337_v13  ;;  %v289_v25 = vld [vmem:[%s490_s4 + $0x1] ss:$0 sm:$0xff]  ;;  %v290_v27 = vld [vmem:[%s490_s4 + $0x2] ss:$0 sm:$0xff]  ;;  %v291_v33 = vld [vmem:[%s490_s4 + $0x3] ss:$0 sm:$0xff] }
  0x1e   :  { %321 = vmatprep.subr.bf16.mxu0 %v413_v0  ;;  %315 = vmatprep.subr.bf16.mxu1 %v413_v0  ;;  %v340_v32 = vld [vmem:[%s489_s3] sm:$0xff]   ;;  %s276_s3 = sshll.u32 %s415_s20, 4  ;;  %s277_s3 = int_to_ptr.vmem [resolvable:$true] %s276_s3 }
  0x1f   :  { %v295_v41 = vld [vmem:[%s490_s4 + $0x4] ss:$0 sm:$0xff]  ;;  %s383_s21 = scalar_lea.vmem %s277_s3, 128  ;;  %p388_p11 = scmp.lt.s32.totalorder %s277_s3, %s277_s3 }
  0x20   :  { %310 = vmatmul.mubr.msk.bf16.vlgmr.msra.gmra.mxu0 %vm67_vm1, %v54_v3  ;;  %p384_p10 = scmp.ne.s32.totalorder %s277_s3, %s383_s21  ;;  %p389_p12 = scmp.lt.s32.totalorder %s383_s21, %s383_s21 }
  0x21   :  { %325 = vmatprep.mubr.msk.bf16.mxu0 %vm414_vm0, %v413_v0  ;;  %316 = vmatpush3.bf16.msra.mxu1 %v338_v14 }
  0x22   :  { %322 = vmatpush3.bf16.msra.mxu0 %v339_v15  ;;  %p390_p13 = por %p389_p12, %p388_p11 }
  0x23   :  { %323 = vmatprep.subr.bf16.mxu0 %v413_v0 }
  0x24   :  { %p391_p0 = pnand %p390_p13, %p384_p10 }
  0x26   :  { %324 = vmatpush3.bf16.msra.mxu0 %v340_v32 }
  0xe0   :  { %v105_v5 = vpop.f32.mrf.mxu0 }
  0xe1   :  { %v106_v6 = vadd.f32 %v286_v4, %v105_v5 }
  0xe2   :  { %v311_v7 = vpop.f32.mrf.mxu0 }
  0xe3   :  { %v112_v8 = vsel %vm111_vm2, %v106_v6, 0.0  ;;  %v117_v9 = vmul.f32 %v106_v6, %v106_v6 }
  0xe4   :  { %v108_v10 = vpop.f32.mrf.mxu0  ;;  %113 = vadd.xlane.f32.xlu0 %v112_v8 }
  0xe5   :  { %v118_v12 = vsel %vm111_vm2, %v117_v9, 0.0 }
  0xe6   :  { %v312_v11 = vpop.f32.mrf.mxu0 }
  0xe8   :  { %119 = vadd.xlane.f32.xlu0 %v118_v12 }
 0x16d   :  { %v114_v16 = vpop.xlane.xlu0 %113 }
 0x16e   :  { %v116_v17 = vmul.f32 0.03125, %v114_v16 }
 0x170   :  { %v122_v19 = vmul.f32 %v116_v17, %v116_v17  ;;  %v124_v23 = vsub.f32 %v106_v6, %v116_v17 }
 0x171   :  { %v120_v18 = vpop.xlane.xlu0 %119 }
 0x172   :  { %v121_v20 = vmul.f32 0.03125, %v120_v18 }
 0x174   :  { %v123_v21 = vsub.f32 %v121_v20, %v122_v19 }
 0x176   :  { %v125_v22 = vadd.f32 1e-05, %v123_v21 }
 0x178   :  { %341 = vrsqrt.f32 %v125_v22 }
 0x185   :  { %v342_v24 = vpop.eup %341 }
 0x186   :  { %v127_v26 = vmul.f32 %v342_v24, %v124_v23 }
 0x188   :  { %v132_v28 = vmul.f32 %v289_v25, %v127_v26 }
 0x18a   :  { %v137_v29 = vadd.f32 %v290_v27, %v132_v28 }
 0x18c   :  { %v138_v30 = vmax.f32 %v137_v29, 0.0 }
 0x18e   :  { %v139_v31 = vpack.c.bf16 %v138_v30, %v138_v30 }
 0x190   :  { %318 = vmatmul.mubr.msk.bf16.vlgmr.msra.gmra.mxu1 %vm111_vm2, %v139_v31 }
 0x250   :  { %v197_v34 = vpop.f32.mrf.mxu1 }
 0x251   :  { %v198_v35 = vadd.f32 %v291_v33, %v197_v34 }
 0x252   :  { %v319_v36 = vpop.f32.mrf.mxu1 }
 0x253   :  { %v203_v37 = vmax.f32 %v198_v35, 0.0 }
 0x254   :  { %v200_v38 = vpop.f32.mrf.mxu1 }
 0x255   :  { %v204_v39 = vpack.c.bf16 %v203_v37, %v203_v37 }
 0x256   :  { %v320_v40 = vpop.f32.mrf.mxu1 }
 0x257   :  { %326 = vmatmul.mubr.msk.bf16.vlgmr.msra.gmra.mxu0 %vm111_vm2, %v204_v39 }
 0x317   :  { %v262_v42 = vpop.f32.mrf.mxu0 }
 0x318   :  { %v263_v43 = vadd.f32 %v295_v41, %v262_v42 }
 0x319   :  { %v327_v44 = vpop.f32.mrf.mxu0 }
 0x31a   :  { %269 = vst.msk [vmem:[#allocation7] sm:$0xff] %vm268_vm3, %v263_v43 }
 0x31b   :  { %v265_v45 = vpop.f32.mrf.mxu0 }
 0x31c   :  { %394 = shalt.err (!%p391_p0)
}
 0x31d   :  { %279 = dma.vmem_to_hbm [thread:$0]  %s277_s3, 128, %s491_s5, [#allocation4]   ;;  %v328_v46 = vpop.f32.mrf.mxu0 }
 0x31e   :  { %407 = dma.done.wait [#allocation4], 128  }
 0x31f   :  { %408 = vsyncadd [#allocation4], 4294967168 }
 0x320   :  { %283 = vsyncpa [#allocation3], 1 }
 0x321   :  { %284 = vsyncpa [#allocation6], 1 }
 0x322   :  { %285 = vsyncpa [#allocation4], 1 }

</bundles_post_ra>
